<compile_context>
chip_gen: v6e
topology: v6e:2x2x1
jax: 0.10.0
libtpu: 0.0.40
codegen_flags: <defaults>
</compile_context>

<pallas_src>
import jax
import jax.numpy as jnp
from jax.experimental import pallas as pl
from jax.experimental.pallas import tpu as pltpu

LN_EPS = 1e-5  # Molmo/OLMo layer_norm_eps


def _round_up(a: int, b: int) -> int:
    return (a + b - 1) // b * b


# ---------------------------------------------------------------------------
# Pre-pass: h = RMSNorm(x) * g  (fp32 math, bf16 output for the MXU)
# ---------------------------------------------------------------------------
def _rmsnorm_kernel(x_ref, g_ref, h_ref):
    # x_ref: (tm, D) row block, g_ref: (1, D) scale, h_ref: (tm, D) bf16 out
    x = x_ref[...].astype(jnp.float32)
    var = jnp.mean(x * x, axis=-1, keepdims=True)
    h = x * jax.lax.rsqrt(var + LN_EPS) * g_ref[...].astype(jnp.float32)
    h_ref[...] = h.astype(h_ref.dtype)


# ---------------------------------------------------------------------------
# Hot loop: pure bf16 matmul with fp32 accumulation on the MXU
# ---------------------------------------------------------------------------
def _vocab_matmul_kernel(h_ref, w_ref, o_ref):
    # h_ref: (tm, D) bf16 (resident across the inner vocab axis)
    # w_ref: (D, tn) bf16 vocab tile
    # o_ref: (tm, tn) logits tile (fp32 by default)
    o_ref[...] = jnp.dot(
        h_ref[...], w_ref[...], preferred_element_type=jnp.float32
    ).astype(o_ref.dtype)


def lm_head(
    hidden_states,          # [B, T, D]
    ln_weight,              # [D]
    ff_out_weight_t,        # [D, V]  (PyTorch Linear.weight transposed)
    *,
    tm: int = 512,          # row tile (outer, parallel).  Raise on v6e (128 MiB VMEM).
    tn: int = 512,          # vocab tile (inner, parallel). Multiple of 256 fills v6e/v7x MXU.
    compute_dtype=jnp.bfloat16,
    out_dtype=jnp.float32,
):
    B, T, D = hidden_states.shape
    Dw, V = ff_out_weight_t.shape
    assert Dw == D
    M = B * T

    # Clamp tiles to the (padded) problem size; keep hardware alignment.
    tm_eff = min(tm, _round_up(M, 8))
    tn_eff = min(tn, _round_up(V, 128))
    Mp = _round_up(M, tm_eff)
    Vp = _round_up(V, tn_eff)

    x2d = hidden_states.reshape(M, D)
    if Mp != M:
        x2d = jnp.pad(x2d, ((0, Mp - M), (0, 0)))
    g2d = ln_weight.reshape(1, D)

    x_bytes = x2d.dtype.itemsize
    out_bytes = jnp.dtype(out_dtype).itemsize
    cd_bytes = jnp.dtype(compute_dtype).itemsize

    # ---- pre-pass: normalize once (removes per-vocab-tile VPU/EUP/XLU work) ----
    h = pl.pallas_call(
        _rmsnorm_kernel,
        out_shape=jax.ShapeDtypeStruct((Mp, D), compute_dtype),
        grid_spec=pltpu.PrefetchScalarGridSpec(
            num_scalar_prefetch=0,
            grid=(Mp // tm_eff,),
            in_specs=[
                pl.BlockSpec((tm_eff, D), lambda i: (i, 0)),
                pl.BlockSpec((1, D), lambda i: (0, 0)),
            ],
            out_specs=pl.BlockSpec((tm_eff, D), lambda i: (i, 0)),
        ),
        compiler_params=pltpu.CompilerParams(
            dimension_semantics=("parallel",),
        ),
        cost_estimate=pl.CostEstimate(
            flops=4 * M * D,
            transcendentals=M,
            bytes_accessed=M * D * (x_bytes + cd_bytes) + D * 4,
        ),
    )(x2d, g2d)

    # ---- weights: stream in bf16, pad vocab dim to a tile multiple ----
    w = ff_out_weight_t.astype(compute_dtype)
    if Vp != V:
        w = jnp.pad(w, ((0, 0), (0, Vp - V)))

    # Explicit VMEM budget: double-buffered h / w / out tiles (+ headroom).
    vmem_need = (
        2 * tm_eff * D * cd_bytes
        + 2 * D * tn_eff * cd_bytes
        + 2 * tm_eff * tn_eff * out_bytes
    )
    vmem_limit = int(max(32 * 1024 * 1024, vmem_need + (16 << 20)))

    logits = pl.pallas_call(
        _vocab_matmul_kernel,
        out_shape=jax.ShapeDtypeStruct((Mp, Vp), out_dtype),
        grid_spec=pltpu.PrefetchScalarGridSpec(
            num_scalar_prefetch=0,
            # Row axis outer, vocab axis innermost: the h block stays resident
            # while the (D, tn) weight tiles stream; W is re-read Mp//tm times.
            grid=(Mp // tm_eff, Vp // tn_eff),
            in_specs=[
                pl.BlockSpec((tm_eff, D), lambda i, j: (i, 0)),
                pl.BlockSpec((D, tn_eff), lambda i, j: (0, j)),
            ],
            out_specs=pl.BlockSpec((tm_eff, tn_eff), lambda i, j: (i, j)),
        ),
        compiler_params=pltpu.CompilerParams(
            dimension_semantics=("parallel", "parallel"),
            vmem_limit_bytes=vmem_limit,
        ),
        cost_estimate=pl.CostEstimate(
            flops=2 * M * D * V,
            transcendentals=0,
            bytes_accessed=D * V * cd_bytes + M * D * cd_bytes + M * V * out_bytes,
        ),
    )(h, w)

    return logits[:M, :V].reshape(B, T, V)


# ---------------------------------------------------------------------------
# References
# ---------------------------------------------------------------------------
def _reference_fp32(hidden_states, ln_weight, w_t):
    x = hidden_states.astype(jnp.float32)
    var = jnp.mean(x * x, axis=-1, keepdims=True)
    h = x * jax.lax.rsqrt(var + LN_EPS) * ln_weight.astype(jnp.float32)
    return jnp.einsum("btd,dv->btv", h, w_t.astype(jnp.float32))


def _reference_matched(hidden_states, ln_weight, w_t, out_dtype=jnp.float32):
    # Same numerics as the kernel: fp32 norm, bf16 matmul operands, fp32 accum.
    x = hidden_states.astype(jnp.float32)
    var = jnp.mean(x * x, axis=-1, keepdims=True)
    h = (x * jax.lax.rsqrt(var + LN_EPS) * ln_weight.astype(jnp.float32)).astype(
        jnp.bfloat16
    )
    return jnp.einsum(
        "btd,dv->btv",
        h,
        w_t.astype(jnp.bfloat16),
        preferred_element_type=jnp.float32,
    ).astype(out_dtype)


if __name__ == "__main__":
    # Small synthetic shapes consistent with the module's forward:
    #   batch=2, seq=8, hidden(d_model)=64, vocab(embedding_size)=256
    B, T, D, V = 2, 8, 64, 256

    key = jax.random.PRNGKey(0)
    kx, kg, kw = jax.random.split(key, 3)

    hidden_states = jax.random.normal(kx, (B, T, D), dtype=jnp.float32)
    ln_weight = 1.0 + 0.01 * jax.random.normal(kg, (D,), dtype=jnp.float32)
    ff_out_weight_t = 0.02 * jax.random.normal(kw, (D, V), dtype=jnp.float32)

    logits = jax.jit(lm_head)(hidden_states, ln_weight, ff_out_weight_t)
    jax.block_until_ready(logits)

    ref_matched = _reference_matched(hidden_states, ln_weight, ff_out_weight_t)
    ref_fp32 = _reference_fp32(hidden_states, ln_weight, ff_out_weight_t)

    assert logits.shape == (B, T, V)
    assert logits.dtype == jnp.float32
    # Tight check vs a reference with identical (bf16-operand, fp32-accum) numerics.
    assert jnp.allclose(logits, ref_matched, atol=1e-3, rtol=1e-3)
    # Loose check vs the full-fp32 PyTorch-semantics reference (bf16 operand noise).
    assert jnp.allclose(logits, ref_fp32, atol=2e-2, rtol=2e-2)

    print("KERNEL_OK")
</pallas_src>

<mosaic_0001>
module attributes {stable_mosaic.version = 11 : i64} {
  func.func @_vocab_matmul_kernel(%arg0: i32, %arg1: i32, %arg2: memref<16x64xbf16, #tpu.memory_space<vmem>>, %arg3: memref<64x256xbf16, #tpu.memory_space<vmem>>, %arg4: memref<16x256xf32, #tpu.memory_space<vmem>>) attributes {dimension_semantics = [#tpu.dimension_semantics<parallel>, #tpu.dimension_semantics<parallel>], iteration_bounds = array<i64: 1, 1>, scalar_prefetch = 0 : i64, scratch_operands = 0 : i64, tpu.core_type = #tpu.core_type<tc>, window_params = [{transform_indices = @transform_0, window_bounds = array<i64: 16, 64>}, {transform_indices = @transform_1, window_bounds = array<i64: 64, 256>}, {transform_indices = @transform_2, window_bounds = array<i64: 16, 256>}]} {
    %c0 = arith.constant 0 : index
    %c0_0 = arith.constant 0 : index
    %0 = vector.load %arg2[%c0, %c0_0] : memref<16x64xbf16, #tpu.memory_space<vmem>>, vector<16x64xbf16>
    %c0_1 = arith.constant 0 : index
    %c0_2 = arith.constant 0 : index
    %1 = vector.load %arg3[%c0_1, %c0_2] : memref<64x256xbf16, #tpu.memory_space<vmem>>, vector<64x256xbf16>
    %cst = arith.constant dense<0.000000e+00> : vector<16x256xf32>
    %2 = tpu.matmul %0, %1, %cst {dimension_numbers = #tpu.dot_dimension_numbers<[1], [0], [0], [1], [0, 0, 1, 1], [], []>} : vector<16x64xbf16>, vector<64x256xbf16>, vector<16x256xf32> -> vector<16x256xf32>
    %c0_3 = arith.constant 0 : index
    %c0_4 = arith.constant 0 : index
    %3 = vector.load %arg4[%c0_3, %c0_4] : memref<16x256xf32, #tpu.memory_space<vmem>>, vector<16x256xf32>
    tpu.vector_store %arg4[%c0_3, %c0_4], %2 {strides = array<i32>} : memref<16x256xf32, #tpu.memory_space<vmem>>, vector<16x256xf32>,
    return
  }
  func.func @transform_0(%arg0: i32, %arg1: i32) -> (i32, i32) {
    %c0_i32 = arith.constant 0 : i32
    %c0_i32_0 = arith.constant 0 : i32
    return %arg0, %c0_i32 : i32, i32
  }
  func.func @transform_1(%arg0: i32, %arg1: i32) -> (i32, i32) {
    %c0_i32 = arith.constant 0 : i32
    %c0_i32_0 = arith.constant 0 : i32
    return %c0_i32, %arg1 : i32, i32
  }
  func.func @transform_2(%arg0: i32, %arg1: i32) -> (i32, i32) {
    %c0_i32 = arith.constant 0 : i32
    return %arg0, %arg1 : i32, i32
  }
}

module attributes {stable_mosaic.version = 11 : i64} {
  func.func @_rmsnorm_kernel(%arg0: i32, %arg1: memref<16x64xf32, #tpu.memory_space<vmem>>, %arg2: memref<1x64xf32, #tpu.memory_space<vmem>>, %arg3: memref<16x64xbf16, #tpu.memory_space<vmem>>) attributes {dimension_semantics = [#tpu.dimension_semantics<parallel>], iteration_bounds = array<i64: 1>, scalar_prefetch = 0 : i64, scratch_operands = 0 : i64, tpu.core_type = #tpu.core_type<tc>, window_params = [{transform_indices = @transform_0, window_bounds = array<i64: 16, 64>}, {pipeline_mode = #tpu.pipeline_mode<synchronous>, transform_indices = @transform_1, window_bounds = array<i64: 1, 64>}, {transform_indices = @transform_2, window_bounds = array<i64: 16, 64>}]} {
    %c0 = arith.constant 0 : index
    %c0_0 = arith.constant 0 : index
    %0 = vector.load %arg1[%c0, %c0_0] : memref<16x64xf32, #tpu.memory_space<vmem>>, vector<16x64xf32>
    %1 = arith.mulf %0, %0 : vector<16x64xf32>
    %cst = arith.constant dense<0.000000e+00> : vector<16xf32>
    %2 = vector.multi_reduction <add>, %1, %cst [1] : vector<16x64xf32> to vector<16xf32>
    %3 = vector.shape_cast %2 : vector<16xf32> to vector<16x1xf32>
    %cst_1 = arith.constant 6.400000e+01 : f32
    %4 = vector.broadcast %cst_1 : f32 to vector<16x1xf32>
    %5 = arith.divf %3, %4 : vector<16x1xf32>
    %cst_2 = arith.constant 9.99999974E-6 : f32
    %6 = vector.broadcast %cst_2 : f32 to vector<16x1xf32>
    %7 = arith.addf %5, %6 : vector<16x1xf32>
    %8 = math.rsqrt %7 : vector<16x1xf32>
    %9 = vector.broadcast %8 : vector<16x1xf32> to vector<16x64xf32>
    %10 = arith.mulf %0, %9 : vector<16x64xf32>
    %c0_3 = arith.constant 0 : index
    %c0_4 = arith.constant 0 : index
    %11 = vector.load %arg2[%c0_3, %c0_4] : memref<1x64xf32, #tpu.memory_space<vmem>>, vector<1x64xf32>
    %12 = vector.broadcast %11 : vector<1x64xf32> to vector<16x64xf32>
    %13 = arith.mulf %10, %12 : vector<16x64xf32>
    %14 = arith.truncf %13 : vector<16x64xf32> to vector<16x64xbf16>
    %c0_5 = arith.constant 0 : index
    %c0_6 = arith.constant 0 : index
    %15 = vector.load %arg3[%c0_5, %c0_6] : memref<16x64xbf16, #tpu.memory_space<vmem>>, vector<16x64xbf16>
    tpu.vector_store %arg3[%c0_5, %c0_6], %14 {strides = array<i32>} : memref<16x64xbf16, #tpu.memory_space<vmem>>, vector<16x64xbf16>,
    return
  }
  func.func @transform_0(%arg0: i32) -> (i32, i32) {
    %c0_i32 = arith.constant 0 : i32
    %c0_i32_0 = arith.constant 0 : i32
    return %arg0, %c0_i32 : i32, i32
  }
  func.func @transform_1(%arg0: i32) -> (i32, i32) {
    %c0_i32 = arith.constant 0 : i32
    %c0_i32_0 = arith.constant 0 : i32
    %c0_i32_1 = arith.constant 0 : i32
    return %c0_i32, %c0_i32_0 : i32, i32
  }
  func.func @transform_2(%arg0: i32) -> (i32, i32) {
    %c0_i32 = arith.constant 0 : i32
    %c0_i32_0 = arith.constant 0 : i32
    return %arg0, %c0_i32 : i32, i32
  }
}

</mosaic_0001>

<bundles_post_ra>
// kernel: lm_head.2
= control target key start
LH: loop header
LB: loop body
LE: loop exit
PB: predicated region body
PF: predicated region fallthrough
CT: control target
= control target key end

     0   :  { %7 = vsyncpa [#allocation3], 0  ;;  %s104_s9 = smov [#allocation2]   ;;  %s134_s0 = inlined_call_operand.hbm [shape: f32[16,64], index: 0, kind: input, shape index: {}]   ;;  %s135_s1 = inlined_call_operand.vmem [shape: f32[1,64], index: 1, kind: input, shape index: {}]   ;;  %s136_s2 = inlined_call_operand.vmem [shape: bf16[16,64], index: 2, kind: output, shape index: {}]  }
   0x1   :  { %s13_s10 = sshll.u32 %s104_s9, 4  ;;  %s14_s10 = int_to_ptr.vmem [resolvable:$true] %s13_s10 }
   0x2   :  { %s90_s11 = scalar_lea.vmem %s14_s10, 256  ;;  %p95_p1 = scmp.lt.s32.totalorder %s14_s10, %s14_s10 }
   0x3   :  { %p91_p0 = scmp.ne.s32.totalorder %s14_s10, %s90_s11  ;;  %p96_p2 = scmp.lt.s32.totalorder %s90_s11, %s90_s11 }
   0x5   :  { %p97_p3 = por %p96_p2, %p95_p1 }
   0x7   :  { %p98_p4 = pnand %p97_p3, %p91_p0 }
   0x9   :  { %101 = shalt.err (!%p98_p4)
}
   0xa   :  { %s105_s12 = smov 128   ;;  %s106_s13 = smov 8  }
   0xb   :  { %19 = dma.hbm_to_vmem [thread:$0]  %s134_s0, 256, %s14_s10, [#allocation3], %s105_s12, %s105_s12, %s106_s13  }
   0xc   :  { %102 = dma.done.wait [#allocation3], 256  }
   0xd   :  { %103 = vsyncadd [#allocation3], 4294967040  ;;  %v25_v0 = vld [vmem:[#allocation2] sm:$0xff]  ;;  %vm29_vm0 = vcmask 523264   ;;  %v26_v1 = vld [vmem:[#allocation2 + $0x8] sm:$0xff]  ;;  %vm62_vm1 = vcmask 519168  }
   0xe   :  { %v27_v2 = vmul.f32 %v25_v0, %v25_v0  ;;  %v28_v3 = vmul.f32 %v26_v1, %v26_v1  ;;  %v70_v13 = vld [vmem:[%s135_s1] ss:$0 sm:$0xff] }
  0x10   :  { %v30_v4 = vsel %vm29_vm0, %v27_v2, 0.0  ;;  %v33_v5 = vsel %vm29_vm0, %v28_v3, 0.0 }
  0x11   :  { %31 = vadd.xlane.f32.xlu0 %v30_v4 }
  0x15   :  { %34 = vadd.xlane.f32.xlu0 %v33_v5 }
  0x9a   :  { %v32_v6 = vpop.xlane.xlu0 %31 }
  0x9b   :  { %v37_v7 = vmul.f32 0.015625, %v32_v6 }
  0x9d   :  { %v39_v8 = vadd.f32 1e-05, %v37_v7 }
  0x9e   :  { %v35_v9 = vpop.xlane.xlu0 %34 }
  0x9f   :  { %78 = vrsqrt.f32 %v39_v8  ;;  %v38_v10 = vmul.f32 0.015625, %v35_v9 }
  0xa1   :  { %v40_v11 = vadd.f32 1e-05, %v38_v10 }
  0xa3   :  { %80 = vrsqrt.f32 %v40_v11 }
  0xac   :  { %v79_v12 = vpop.eup %78 }
  0xad   :  { %v43_v14 = vmul.f32 %v79_v12, %v25_v0 }
  0xaf   :  { %v52_v15 = vmul.f32 %v70_v13, %v43_v14 }
  0xb0   :  { %v81_v16 = vpop.eup %80 }
  0xb1   :  { %v73_v17 = vpack.c.bf16 %v52_v15, %v52_v15  ;;  %v44_v18 = vmul.f32 %v81_v16, %v26_v1 }
  0xb3   :  { %63 = vst.msk [vmem:[%s136_s2] sm:$0xf] %vm62_vm1, %v73_v17  ;;  %v53_v19 = vmul.f32 %v70_v13, %v44_v18 }
  0xb5   :  { %v74_v20 = vpack.c.bf16 %v53_v19, %v53_v19 }
  0xb7   :  { %64 = vst.msk [vmem:[%s136_s2 + $0x4] sm:$0xf] %vm62_vm1, %v74_v20 }
  0xb8   :  { %69 = vsyncpa [#allocation3], 1 }

// kernel: lm_head.3
= control target key start
LH: loop header
LB: loop body
LE: loop exit
PB: predicated region body
PF: predicated region fallthrough
CT: control target
= control target key end

     0   :  { %v184_v2 = vmov 0   ;;  %s233_s0 = inlined_call_operand.vmem [shape: bf16[16,64], index: 0, kind: input, shape index: {}]   ;;  %s234_s1 = inlined_call_operand.vmem [shape: bf16[64,256], index: 1, kind: input, shape index: {}]   ;;  %s235_s2 = inlined_call_operand.hbm [shape: f32[16,256], index: 2, kind: output, shape index: {}]  }
   0x1   :  { %v149_v0 = vld [vmem:[%s234_s1 + $0x34] ss:$8 sps:$4 sm:$0xff]   ;;  %v151_v1 = vld [vmem:[%s234_s1 + $0x30] ss:$8 sps:$4 sm:$0xff]   ;;  %104 = vmatprep.mubr.bf16.mxu0 %v184_v2  ;;  %v152_v3 = vld [vmem:[%s234_s1 + $0x24] ss:$8 sps:$4 sm:$0xff]  }
   0x2   :  { %80 = vmatprep.subr.bf16.mxu0 %v149_v0  ;;  %v154_v4 = vld [vmem:[%s234_s1 + $0x20] ss:$8 sps:$4 sm:$0xff]   ;;  %v155_v5 = vld [vmem:[%s234_s1 + $0x14] ss:$8 sps:$4 sm:$0xff]  }
   0x3   :  { %81 = vmatpush1.bf16.msra.mxu0 %v151_v1 }
   0x4   :  { %82 = vmatprep.subr.bf16.mxu0 %v152_v3 }
   0x5   :  { %7 = vsyncpa [#allocation3], 0  ;;  %v157_v6 = vld [vmem:[%s234_s1 + $0x10] ss:$8 sps:$4 sm:$0xff]   ;;  %v158_v7 = vld [vmem:[%s234_s1 + $0x4] ss:$8 sps:$4 sm:$0xff]  }
   0x6   :  { %v160_v8 = vld [vmem:[%s234_s1] ss:$8 sps:$4 sm:$0xff]   ;;  %vm68_vm0 = vcmask 523264   ;;  %s185_s27 = smov [#allocation2]  }
   0x7   :  { %83 = vmatpush1.bf16.msra.mxu0 %v154_v4  ;;  %v161_v9 = vld [vmem:[%s233_s0] sm:$0xff]   ;;  %s124_s28 = sshll.u32 %s185_s27, 4  ;;  %s125_s28 = int_to_ptr.vmem [resolvable:$true] %s124_s28 }
   0x8   :  { %84 = vmatprep.subr.bf16.mxu0 %v155_v5  ;;  %s162_s1 = scalar_lea.vmem %s125_s28, 512  ;;  %p167_p1 = scmp.lt.s32.totalorder %s125_s28, %s125_s28 }
   0x9   :  { %p163_p0 = scmp.ne.s32.totalorder %s125_s28, %s162_s1  ;;  %p168_p2 = scmp.lt.s32.totalorder %s162_s1, %s162_s1 }
   0xb   :  { %85 = vmatpush1.bf16.msra.mxu0 %v157_v6  ;;  %p169_p3 = por %p168_p2, %p167_p1 }
   0xc   :  { %86 = vmatprep.subr.bf16.mxu0 %v158_v7 }
   0xd   :  { %p170_p4 = pnand %p169_p3, %p163_p0 }
   0xf   :  { %87 = vmatpush1.bf16.msra.mxu0 %v160_v8 }
  0x12   :  { %144 = vmatmul.mubr.msk.bf16.vlgmr.msra.gmra.mxu0 %vm68_vm0, %v161_v9 }
  0xd2   :  { %v106_v10 = vpop.f32.mrf.mxu0 }
  0xd3   :  { %115 = vst [vmem:[#allocation2] sm:$0xff] %v106_v10 }
  0xd4   :  { %v108_v11 = vpop.f32.mrf.mxu0 }
  0xd5   :  { %116 = vst [vmem:[#allocation2 + $0x8] sm:$0xff] %v108_v11 }
  0xd6   :  { %v110_v12 = vpop.f32.mrf.mxu0 }
  0xd7   :  { %117 = vst [vmem:[#allocation2 + $0x10] sm:$0xff] %v110_v12 }
  0xd8   :  { %v112_v13 = vpop.f32.mrf.mxu0 }
  0xd9   :  { %118 = vst [vmem:[#allocation2 + $0x18] sm:$0xff] %v112_v13 }
  0xda   :  { %173 = shalt.err (!%p170_p4)
}
  0xdb   :  { %s186_s0 = smov 256   ;;  %s187_s29 = smov 16  }
  0xdc   :  { %130 = dma.vmem_to_hbm [thread:$0]  %s125_s28, 512, %s235_s2, [#allocation3], %s186_s0, %s186_s0, %s187_s29  }
  0xdd   :  { %182 = dma.done.wait [#allocation3], 512  }
  0xde   :  { %183 = vsyncadd [#allocation3], 4294966784 }
  0xdf   :  { %134 = vsyncpa [#allocation3], 1 }

</bundles_post_ra>
